<compile_context>
chip_gen: v7x
topology: tpu7x:2x2x1
jax: 0.10.0
libtpu: 0.0.40
codegen_flags: <defaults>
</compile_context>

<pallas_src>
import jax
import jax.numpy as jnp
from jax.experimental import pallas as pl
from jax.experimental.pallas import tpu as pltpu


def _round_up(x, m):
    return ((x + m - 1) // m) * m


def _round_down(x, m):
    return (x // m) * m


def _vmem_capacity_bytes():
    """Per-core VMEM capacity; conservative fallback if the query fails."""
    try:
        return int(pltpu.get_tpu_info().vmem_capacity_bytes)
    except Exception:
        return 64 * 1024 * 1024  # v7x per-TensorCore VMEM (smallest of the fleet)


# ---------------------------------------------------------------------------
# Kernels
# ---------------------------------------------------------------------------
def _residual_add_kernel(x_ref, w_ref, b_ref, o_ref):
    """out = x @ W + b + x, full (Hp, Hp) weight resident in VMEM."""
    x = x_ref[...]
    fn_out = jnp.dot(x.astype(w_ref.dtype), w_ref[...],
                     preferred_element_type=jnp.float32)
    fn_out = fn_out + b_ref[...]
    # residual add in f32, cast back to the I/O dtype
    o_ref[...] = (fn_out + x.astype(jnp.float32)).astype(o_ref.dtype)


def _residual_add_ktiled_kernel(x_ref, xres_ref, w_ref, b_ref, o_ref, acc_ref):
    """K-tiled variant: grid = (row tiles, K tiles), f32 accumulator scratch."""
    k = pl.program_id(1)

    @pl.when(k == 0)
    def _():
        acc_ref[...] = jnp.zeros_like(acc_ref)

    acc_ref[...] += jnp.dot(x_ref[...].astype(w_ref.dtype), w_ref[...],
                            preferred_element_type=jnp.float32)

    @pl.when(k == pl.num_programs(1) - 1)
    def _():
        o_ref[...] = (acc_ref[...] + b_ref[...]
                      + xres_ref[...].astype(jnp.float32)).astype(o_ref.dtype)


# ---------------------------------------------------------------------------
# Wrappers
# ---------------------------------------------------------------------------
def prepare_fn_params(w, b, *, matmul_dtype=jnp.bfloat16):
    """Hoisted (per-layer, not per-call) cast/pad of the Linear parameters.

    Returns wp: (Hp, Hp) in matmul_dtype and b2: (1, Hp) f32, Hp = round_up(H, 128).
    Padded rows/cols are zero, so they contribute nothing to the matmul.
    """
    H = w.shape[0]
    assert w.shape == (H, H) and b.shape == (H,)
    Hp = _round_up(H, 128)
    wp = w.astype(matmul_dtype)
    b2 = b.astype(jnp.float32).reshape(1, H)
    if Hp != H:
        wp = jnp.pad(wp, ((0, Hp - H), (0, Hp - H)))
        b2 = jnp.pad(b2, ((0, 0), (0, Hp - H)))
    return wp, b2


def residual_add(x, wp, b2, *, tile_rows=None, k_tile=None,
                 vmem_budget=None, force_k_tiling=False):
    """out = fn(x) + x with fn(x) = x @ W + b (W, b from prepare_fn_params).

    x: (B, S, H).  Returns (B, S, H) in x.dtype (residual added in f32).
    """
    B, S, H = x.shape
    M = B * S
    Hp = wp.shape[0]
    assert wp.shape == (Hp, Hp) and b2.shape == (1, Hp)
    assert Hp == _round_up(H, 128)

    io_dtype = x.dtype
    itemsize = jnp.dtype(io_dtype).itemsize
    w_itemsize = jnp.dtype(wp.dtype).itemsize
    # sublane packing of the row dimension (8 for f32, 16 for bf16, 32 for i8)
    sub = 8 if itemsize >= 4 else (16 if itemsize == 2 else 32)

    vmem_cap = _vmem_capacity_bytes()
    if vmem_budget is None:
        vmem_budget = (vmem_cap * 3) // 4           # headroom for compiler scratch
    vmem_limit = int(min(max(vmem_cap, 32 << 20), 128 << 20))

    # ---- x layout: flatten rows; pad columns ONLY when lane-unaligned -------
    x2 = x.reshape(M, H)
    if Hp != H:
        # One copy of x; only taken for lane-unaligned hidden sizes.
        x2 = jnp.pad(x2, ((0, 0), (0, Hp - H)))
    # Rows are NOT padded: the trailing partial row block is masked by Pallas
    # (garbage rows only produce garbage output rows, which are dropped).

    # ---- row tile ------------------------------------------------------------
    if tile_rows is None:
        tile_rows = 2048 if vmem_cap >= (96 << 20) else 1024
    if M <= tile_rows:
        tr = M                       # block dim == full array dim: always legal
    else:
        tr = max(sub, _round_down(tile_rows, sub))
    # keep the MXU fed / per-step overhead amortised: never shrink below ~256
    tr_floor = max(sub, min(tr, 256))

    w_bytes = Hp * Hp * w_itemsize
    margin = 1 << 20

    def resident_vmem(t):
        # W and b single-buffered (pl.Buffered(1)); x/out double-buffered.
        return w_bytes + Hp * 4 + 4 * t * Hp * itemsize + margin

    use_k = force_k_tiling or resident_vmem(tr_floor) > vmem_budget

    cost = pl.CostEstimate(
        flops=2 * M * Hp * Hp,
        transcendentals=0,
        bytes_accessed=(3 if use_k else 2) * M * Hp * itemsize
        + Hp * Hp * w_itemsize + Hp * 4,
    )

    if not use_k:
        while tr > tr_floor and resident_vmem(tr) > vmem_budget:
            tr = max(tr_floor, _round_down(tr // 2, sub) or sub)
        grid = (pl.cdiv(M, tr),)

        out2 = pl.pallas_call(
            _residual_add_kernel,
            out_shape=jax.ShapeDtypeStruct((M, Hp), io_dtype),
            grid_spec=pltpu.PrefetchScalarGridSpec(
                num_scalar_prefetch=0,
                grid=grid,
                in_specs=[
                    # x row tile (streamed, double-buffered)
                    pl.BlockSpec((tr, Hp), lambda i: (i, 0)),
                    # resident weight: single buffer (constant index map)
                    pl.BlockSpec((Hp, Hp), lambda i: (0, 0),
                                 pipeline_mode=pl.Buffered(1)),
                    # resident bias: single buffer
                    pl.BlockSpec((1, Hp), lambda i: (0, 0),
                                 pipeline_mode=pl.Buffered(1)),
                ],
                out_specs=pl.BlockSpec((tr, Hp), lambda i: (i, 0)),
            ),
            # Output aliases the x slab (mirrors PyTorch's in-place `x += res`).
            input_output_aliases={0: 0},
            compiler_params=pltpu.CompilerParams(
                dimension_semantics=("parallel",),
                vmem_limit_bytes=vmem_limit,
            ),
            cost_estimate=cost,
        )(x2, wp, b2)
    else:
        # ---- K-tiled fallback: weight streamed in (tk, Hp) slabs -------------
        if k_tile is not None:
            assert Hp % k_tile == 0 and k_tile % 128 == 0
            tk = k_tile
        else:
            tk = 128
            for cand in (2048, 1024, 512, 256, 128):
                if Hp % cand == 0:
                    tk = cand
                    break

        def ktiled_vmem(t, k):
            return (2 * t * k * itemsize          # x (lhs, streamed over K)
                    + 2 * t * Hp * itemsize       # x (residual, constant over K)
                    + 2 * k * Hp * w_itemsize     # weight K-slabs
                    + 2 * t * Hp * itemsize       # output tiles
                    + t * Hp * 4                  # f32 accumulator scratch
                    + Hp * 4 + margin)

        if k_tile is None:
            while tk > 128 and ktiled_vmem(tr_floor, tk) > vmem_budget:
                tk //= 2
        while tr > tr_floor and ktiled_vmem(tr, tk) > vmem_budget:
            tr = max(tr_floor, _round_down(tr // 2, sub) or sub)

        grid = (pl.cdiv(M, tr), Hp // tk)

        out2 = pl.pallas_call(
            _residual_add_ktiled_kernel,
            out_shape=jax.ShapeDtypeStruct((M, Hp), io_dtype),
            grid_spec=pltpu.PrefetchScalarGridSpec(
                num_scalar_prefetch=0,
                grid=grid,
                in_specs=[
                    pl.BlockSpec((tr, tk), lambda i, k: (i, k)),   # x (lhs)
                    pl.BlockSpec((tr, Hp), lambda i, k: (i, 0)),   # x (residual)
                    pl.BlockSpec((tk, Hp), lambda i, k: (k, 0)),   # weight slab
                    pl.BlockSpec((1, Hp), lambda i, k: (0, 0),
                                 pipeline_mode=pl.Buffered(1)),    # bias
                ],
                out_specs=pl.BlockSpec((tr, Hp), lambda i, k: (i, 0)),
                scratch_shapes=[pltpu.VMEM((tr, Hp), jnp.float32)],
            ),
            compiler_params=pltpu.CompilerParams(
                dimension_semantics=("parallel", "arbitrary"),
                vmem_limit_bytes=vmem_limit,
            ),
            cost_estimate=cost,
        )(x2, x2, wp, b2)

    if Hp != H:
        out2 = out2[:, :H]
    return out2.reshape(B, S, H)


if __name__ == "__main__":
    key = jax.random.PRNGKey(0)
    kx, kw, kb = jax.random.split(key, 3)

    # Small shapes consistent with the conformer block: (batch, seq, hidden).
    B, S, H = 2, 8, 32
    x = jax.random.normal(kx, (B, S, H), dtype=jnp.float32)
    w = jax.random.normal(kw, (H, H), dtype=jnp.float32) * 0.02
    b = jax.random.normal(kb, (H,), dtype=jnp.float32) * 0.02

    # weight cast/pad hoisted out of the per-call path
    wp, b2 = prepare_fn_params(w, b)

    out = residual_add(x, wp, b2)
    jax.block_until_ready(out)

    ref = x @ w + b + x            # pure-JAX f32 reference:  out = fn(x) + x
    assert out.shape == (B, S, H)
    assert jnp.allclose(out, ref, atol=2e-2, rtol=1e-2)

    # bf16 I/O path (memory-bound win on v6e/v7x); residual accumulated in f32.
    x_bf16 = x.astype(jnp.bfloat16)
    out_bf16 = residual_add(x_bf16, wp, b2)
    jax.block_until_ready(out_bf16)
    assert out_bf16.dtype == jnp.bfloat16
    assert jnp.allclose(out_bf16.astype(jnp.float32), ref, atol=6e-2, rtol=6e-2)

    # K-tiled fallback path (large-H / small-VMEM regime), forced here at a
    # small shape to validate the accumulator + pl.when init/finalize logic.
    B2, S2, H2 = 2, 16, 256
    kx2, kw2, kb2 = jax.random.split(jax.random.PRNGKey(1), 3)
    xk = jax.random.normal(kx2, (B2, S2, H2), dtype=jnp.float32)
    wk = jax.random.normal(kw2, (H2, H2), dtype=jnp.float32) * 0.02
    bk = jax.random.normal(kb2, (H2,), dtype=jnp.float32) * 0.02
    wpk, bbk = prepare_fn_params(wk, bk)
    out_k = residual_add(xk, wpk, bbk, force_k_tiling=True, k_tile=128)
    jax.block_until_ready(out_k)
    ref_k = xk @ wk + bk + xk
    assert jnp.allclose(out_k, ref_k, atol=2e-2, rtol=1e-2)

    print("KERNEL_OK")
</pallas_src>

<mosaic_0001>
module attributes {stable_mosaic.version = 11 : i64} {
  func.func @_residual_add_kernel(%arg0: i32, %arg1: memref<16x128xf32, #tpu.memory_space<vmem>>, %arg2: memref<128x128xbf16, #tpu.memory_space<vmem>>, %arg3: memref<1x128xf32, #tpu.memory_space<vmem>>, %arg4: memref<16x128xf32, #tpu.memory_space<vmem>>) attributes {dimension_semantics = [#tpu.dimension_semantics<parallel>], iteration_bounds = array<i64: 1>, scalar_prefetch = 0 : i64, scratch_operands = 0 : i64, tpu.core_type = #tpu.core_type<tc>, window_params = [{transform_indices = @transform_0, window_bounds = array<i64: 16, 128>}, {pipeline_mode = #tpu.pipeline_mode<synchronous>, transform_indices = @transform_1, window_bounds = array<i64: 128, 128>}, {pipeline_mode = #tpu.pipeline_mode<synchronous>, transform_indices = @transform_2, window_bounds = array<i64: 1, 128>}, {transform_indices = @transform_3, window_bounds = array<i64: 16, 128>}]} {
    %c0 = arith.constant 0 : index
    %c0_0 = arith.constant 0 : index
    %0 = vector.load %arg1[%c0, %c0_0] : memref<16x128xf32, #tpu.memory_space<vmem>>, vector<16x128xf32>
    %1 = arith.truncf %0 : vector<16x128xf32> to vector<16x128xbf16>
    %c0_1 = arith.constant 0 : index
    %c0_2 = arith.constant 0 : index
    %2 = vector.load %arg2[%c0_1, %c0_2] : memref<128x128xbf16, #tpu.memory_space<vmem>>, vector<128x128xbf16>
    %cst = arith.constant dense<0.000000e+00> : vector<16x128xf32>
    %3 = tpu.matmul %1, %2, %cst {dimension_numbers = #tpu.dot_dimension_numbers<[1], [0], [0], [1], [0, 0, 1, 1], [], []>} : vector<16x128xbf16>, vector<128x128xbf16>, vector<16x128xf32> -> vector<16x128xf32>
    %c0_3 = arith.constant 0 : index
    %c0_4 = arith.constant 0 : index
    %4 = vector.load %arg3[%c0_3, %c0_4] : memref<1x128xf32, #tpu.memory_space<vmem>>, vector<1x128xf32>
    %5 = vector.broadcast %4 : vector<1x128xf32> to vector<16x128xf32>
    %6 = arith.addf %3, %5 : vector<16x128xf32>
    %7 = arith.addf %6, %0 : vector<16x128xf32>
    %c0_5 = arith.constant 0 : index
    %c0_6 = arith.constant 0 : index
    %8 = vector.load %arg4[%c0_5, %c0_6] : memref<16x128xf32, #tpu.memory_space<vmem>>, vector<16x128xf32>
    tpu.vector_store %arg4[%c0_5, %c0_6], %7 {strides = array<i32>} : memref<16x128xf32, #tpu.memory_space<vmem>>, vector<16x128xf32>,
    return
  }
  func.func @transform_0(%arg0: i32) -> (i32, i32) {
    %c0_i32 = arith.constant 0 : i32
    %c0_i32_0 = arith.constant 0 : i32
    return %arg0, %c0_i32 : i32, i32
  }
  func.func @transform_1(%arg0: i32) -> (i32, i32) {
    %c0_i32 = arith.constant 0 : i32
    %c0_i32_0 = arith.constant 0 : i32
    %c0_i32_1 = arith.constant 0 : i32
    return %c0_i32, %c0_i32_0 : i32, i32
  }
  func.func @transform_2(%arg0: i32) -> (i32, i32) {
    %c0_i32 = arith.constant 0 : i32
    %c0_i32_0 = arith.constant 0 : i32
    %c0_i32_1 = arith.constant 0 : i32
    return %c0_i32, %c0_i32_0 : i32, i32
  }
  func.func @transform_3(%arg0: i32) -> (i32, i32) {
    %c0_i32 = arith.constant 0 : i32
    %c0_i32_0 = arith.constant 0 : i32
    return %arg0, %c0_i32 : i32, i32
  }
}

</mosaic_0001>

<bundles_post_ra>
// kernel: tpu_custom_call.1
= control target key start
LH: loop header
LB: loop body
LE: loop exit
PB: predicated region body
PF: predicated region fallthrough
CT: control target
= control target key end

     0   :  { %8 = vsyncpa [#allocation3], 0  ;;  %s426_s0 = inlined_call_operand.hbm [shape: f32[16,128], index: 0, kind: input, shape index: {}, may-alias: {0,3}]   ;;  %s427_s1 = inlined_call_operand.hbm [shape: bf16[128,128], index: 1, kind: input, shape index: {}]   ;;  %s428_s2 = inlined_call_operand.hbm [shape: f32[1,128], index: 2, kind: input, shape index: {}]   ;;  %s429_s3 = inlined_call_operand.hbm [shape: f32[16,128], index: 3, kind: output, shape index: {}, may-alias: {0,3}]  }
   0x1   :  { %9 = vsyncpa [#allocation6], 0 }
   0x2   :  { %10 = vsyncpa [#allocation4], 0  ;;  %s342_s12 = smov [#allocation5]   ;;  %s248_s16 = scalar_lea.hbm %s427_s1, 1024 }
   0x3   :  { %s28_s13 = sshll.u32 %s342_s12, 4  ;;  %p249_p0 = scmp.ne.s32.totalorder %s427_s1, %s248_s16  ;;  %s29_s13 = int_to_ptr.vmem [resolvable:$true] %s28_s13 }
   0x4   :  { %p252_p1 = scmp.lt.u32.totalorder %s248_s16, %s427_s1 }
   0x6   :  { %p254_p2 = pnand %p252_p1, %p249_p0 }
   0x8   :  { %257 = shalt.err (!%p254_p2)
}
   0x9   :  { %s258_s21 = scalar_lea.vmem %s29_s13, 1024  ;;  %p263_p4 = scmp.lt.s32.totalorder %s29_s13, %s29_s13 }
   0xa   :  { %p259_p3 = scmp.ne.s32.totalorder %s29_s13, %s258_s21  ;;  %p264_p5 = scmp.lt.s32.totalorder %s258_s21, %s258_s21 }
   0xc   :  { %p265_p6 = por %p264_p5, %p263_p4 }
   0xe   :  { %p266_p7 = pnand %p265_p6, %p259_p3 }
  0x10   :  { %269 = shalt.err (!%p266_p7)
}
  0x11   :  { %s343_s22 = smov 64   ;;  %s344_s23 = smov 4  }
  0x12   :  { %34 = dma.hbm_to_vmem [thread:$0]  %s427_s1, 1024, %s29_s13, [#allocation6], %s343_s22, %s343_s22, %s344_s23  }
  0x13   :  { %s345_s26 = smov [#allocation2]   ;;  %s270_s30 = scalar_lea.hbm %s426_s0, 256 }
  0x14   :  { %s16_s27 = sshll.u32 %s345_s26, 4  ;;  %p271_p8 = scmp.ne.s32.totalorder %s426_s0, %s270_s30  ;;  %s17_s27 = int_to_ptr.vmem [resolvable:$true] %s16_s27 }
  0x15   :  { %p274_p9 = scmp.lt.u32.totalorder %s270_s30, %s426_s0 }
  0x17   :  { %p276_p10 = pnand %p274_p9, %p271_p8 }
  0x19   :  { %279 = shalt.err (!%p276_p10)
}
  0x1a   :  { %s280_s8 = scalar_lea.vmem %s17_s27, 256  ;;  %p285_p12 = scmp.lt.s32.totalorder %s17_s27, %s17_s27 }
  0x1b   :  { %p281_p11 = scmp.ne.s32.totalorder %s17_s27, %s280_s8  ;;  %p286_p13 = scmp.lt.s32.totalorder %s280_s8, %s280_s8 }
  0x1d   :  { %p287_p0 = por %p286_p13, %p285_p12 }
  0x1f   :  { %p288_p1 = pnand %p287_p0, %p281_p11 }
  0x21   :  { %291 = shalt.err (!%p288_p1)
}
  0x22   :  { %s346_s1 = smov 128   ;;  %s347_s9 = smov 8  }
  0x23   :  { %22 = dma.hbm_to_vmem [thread:$0]  %s426_s0, 256, %s17_s27, [#allocation3], %s346_s1, %s346_s1, %s347_s9  }
  0x24   :  { %s348_s12 = smov [#allocation7]   ;;  %s292_s16 = scalar_lea.hbm %s428_s2, 16 }
  0x25   :  { %s41_s13 = sshll.u32 %s348_s12, 4  ;;  %p293_p2 = scmp.ne.s32.totalorder %s428_s2, %s292_s16  ;;  %s42_s13 = int_to_ptr.vmem [resolvable:$true] %s41_s13 }
  0x26   :  { %p296_p3 = scmp.lt.u32.totalorder %s292_s16, %s428_s2 }
  0x28   :  { %p298_p4 = pnand %p296_p3, %p293_p2 }
  0x2a   :  { %301 = shalt.err (!%p298_p4)
}
  0x2b   :  { %s302_s21 = scalar_lea.vmem %s42_s13, 16  ;;  %s306_s0 = scalar_lea.vmem %s42_s13, 32 }
  0x2c   :  { %p303_p5 = scmp.ne.s32.totalorder %s42_s13, %s302_s21  ;;  %p307_p6 = scmp.lt.s32.totalorder %s42_s13, %s42_s13 }
  0x2d   :  { %p308_p7 = scmp.lt.s32.totalorder %s306_s0, %s302_s21 }
  0x2f   :  { %p309_p8 = por %p308_p7, %p307_p6 }
  0x31   :  { %p310_p9 = pnand %p309_p8, %p303_p5 }
  0x33   :  { %313 = shalt.err (!%p310_p9)
}
  0x34   :  { %44 = dma.hbm_to_vmem [thread:$0]  %s428_s2, 16, %s42_s13, [#allocation6]  }
  0x35   :  { %336 = dma.done.wait [#allocation3], 256  }
  0x36   :  { %337 = vsyncadd [#allocation3], 4294967040 }
  0x37   :  { %338 = dma.done.wait [#allocation6], 1040  }
  0x38   :  { %339 = vsyncadd [#allocation6], 4294966256  ;;  %v349_v0 = vmov 0.0   ;;  %vm350_vm0 = vmmov 0   ;;  %v240_v1 = vld [vmem:[#allocation5] sm:$0xff]   ;;  %v241_v2 = vld [vmem:[#allocation5 + $0x8] sm:$0xff]  }
  0x39   :  { %210 = vmatprep.subr.bf16.mxu0 %v349_v0  ;;  %226 = vmatprep.mubr.msk.bf16.mxu0 %vm350_vm0, %v349_v0  ;;  %v242_v3 = vld [vmem:[#allocation5 + $0x10] sm:$0xff]   ;;  %v243_v4 = vld [vmem:[#allocation5 + $0x18] sm:$0xff]   ;;  %v244_v5 = vld [vmem:[#allocation5 + $0x20] sm:$0xff]   ;;  %s351_s2 = smov [#allocation8]  }
  0x3a   :  { %211 = vmatpush3.bf16.msra.mxu0 %v240_v1  ;;  %v245_v6 = vld [vmem:[#allocation5 + $0x28] sm:$0xff]   ;;  %v246_v7 = vld [vmem:[#allocation5 + $0x30] sm:$0xff]   ;;  %v247_v8 = vld [vmem:[#allocation5 + $0x38] sm:$0xff]   ;;  %s179_s24 = sshll.u32 %s351_s2, 4  ;;  %s180_s24 = int_to_ptr.vmem [resolvable:$true] %s179_s24 }
  0x3b   :  { %212 = vmatprep.subr.bf16.mxu0 %v349_v0  ;;  %v55_v9 = vld [vmem:[#allocation2] sm:$0xff]  ;;  %v56_v10 = vld [vmem:[#allocation2 + $0x8] sm:$0xff]  ;;  %v192_v12 = vld [vmem:[#allocation7] ss:$0 sm:$0xff]  ;;  %s314_s25 = scalar_lea.vmem %s180_s24, 256  ;;  %p319_p11 = scmp.lt.s32.totalorder %s180_s24, %s180_s24 }
  0x3c   :  { %v57_v11 = vpack.c.bf16 %v56_v10, %v55_v9  ;;  %p315_p10 = scmp.ne.s32.totalorder %s180_s24, %s314_s25  ;;  %p320_p12 = scmp.lt.s32.totalorder %s314_s25, %s314_s25 }
  0x3e   :  { %213 = vmatpush3.bf16.msra.mxu0 %v241_v2  ;;  %p321_p13 = por %p320_p12, %p319_p11 }
  0x3f   :  { %214 = vmatprep.subr.bf16.mxu0 %v349_v0 }
  0x40   :  { %p322_p0 = pnand %p321_p13, %p315_p10 }
  0x42   :  { %215 = vmatpush3.bf16.msra.mxu0 %v242_v3 }
  0x43   :  { %216 = vmatprep.subr.bf16.mxu0 %v349_v0 }
  0x46   :  { %217 = vmatpush3.bf16.msra.mxu0 %v243_v4 }
  0x47   :  { %218 = vmatprep.subr.bf16.mxu0 %v349_v0 }
  0x4a   :  { %219 = vmatpush3.bf16.msra.mxu0 %v244_v5 }
  0x4b   :  { %220 = vmatprep.subr.bf16.mxu0 %v349_v0 }
  0x4e   :  { %221 = vmatpush3.bf16.msra.mxu0 %v245_v6 }
  0x4f   :  { %222 = vmatprep.subr.bf16.mxu0 %v349_v0 }
  0x52   :  { %223 = vmatpush3.bf16.msra.mxu0 %v246_v7 }
  0x53   :  { %224 = vmatprep.subr.bf16.mxu0 %v349_v0 }
  0x56   :  { %225 = vmatpush3.bf16.msra.mxu0 %v247_v8 }
  0x59   :  { %227 = vmatmul.mubr.bf16.vlgmr.msra.gmra.mrb[0].mxu0 %v57_v11 }
 0x12c   :  { %v163_v13 = vpop.f32.mrb[0].mxu0 }
 0x12d   :  { %v164_v14 = vadd.f32 %v192_v12, %v163_v13  ;;  %v228_v15 = vpop.f32.mrb[1].mxu0 }
 0x12e   :  { %v166_v16 = vpop.f32.mrb[2].mxu0 }
 0x12f   :  { %v170_v17 = vadd.f32 %v164_v14, %v55_v9  ;;  %v167_v18 = vadd.f32 %v192_v12, %v166_v16  ;;  %v229_v19 = vpop.f32.mrb[3].mxu0 }
 0x131   :  { %172 = vst [vmem:[#allocation8] sm:$0xff] %v170_v17  ;;  %v171_v20 = vadd.f32 %v167_v18, %v56_v10 }
 0x133   :  { %173 = vst [vmem:[#allocation8 + $0x8] sm:$0xff] %v171_v20 }
 0x134   :  { %325 = shalt.err (!%p322_p0)
}
 0x135   :  { %s326_s28 = scalar_lea.hbm %s429_s3, 256 }
 0x136   :  { %p327_p1 = scmp.ne.s32.totalorder %s429_s3, %s326_s28  ;;  %p330_p2 = scmp.lt.u32.totalorder %s326_s28, %s429_s3 }
 0x138   :  { %p332_p3 = pnand %p330_p2, %p327_p1 }
 0x13a   :  { %335 = shalt.err (!%p332_p3)
}
 0x13b   :  { %185 = dma.vmem_to_hbm [thread:$0]  %s180_s24, 256, %s429_s3, [#allocation4], %s346_s1, %s346_s1, %s347_s9  }
 0x13c   :  { %340 = dma.done.wait [#allocation4], 256  }
 0x13d   :  { %341 = vsyncadd [#allocation4], 4294967040 }
 0x13e   :  { %189 = vsyncpa [#allocation3], 1 }
 0x13f   :  { %190 = vsyncpa [#allocation6], 1 }
 0x140   :  { %191 = vsyncpa [#allocation4], 1 }

</bundles_post_ra>
